<compile_context>
chip_gen: v6e
topology: v6e:2x2x1
jax: 0.10.0
libtpu: 0.0.40
codegen_flags: <defaults>
</compile_context>

<pallas_src>
import functools
import inspect
import math

import jax
import jax.numpy as jnp
from jax import lax
from jax.experimental import pallas as pl
from jax.experimental.pallas import tpu as pltpu

_INV_SQRT2 = 1.0 / math.sqrt(2.0)

try:
    _HAS_SINGLE_BUFFER = (
        hasattr(pl, "Buffered")
        and "pipeline_mode" in inspect.signature(pl.BlockSpec).parameters)
except (TypeError, ValueError):
    _HAS_SINGLE_BUFFER = False


def _gelu_exact(x):
    # torch.nn.GELU() default = exact erf formulation (kept for parity; the
    # tanh approximation would move work VALU->EUP but changes numerics).
    return 0.5 * x * (1.0 + lax.erf(x * _INV_SQRT2))


def _round_up(x, m):
    return ((x + m - 1) // m) * m


def _chip_defaults():
    """Per-generation (tile_m, block_k, vmem_limit_bytes, two_batch_tiles).

    tile_m sets the arithmetic intensity of the W2 stream (~tile_m FLOP/byte),
    so it is sized against each generation's compute/bandwidth ridge; the VMEM
    limit is sized against physical VMEM (128 MiB v5e/v6e, 64 MiB per-TC v7x).
    """
    kind = ""
    try:
        kind = jax.devices()[0].device_kind.lower()
    except Exception:
        pass
    vmem = None
    try:
        vmem = int(pltpu.get_tpu_info().vmem_capacity_bytes)
    except Exception:
        pass
    if "v6" in kind:                                  # v6e / Trillium
        return 768, 1024, 100 * 1024 * 1024, False
    if "v5 lite" in kind or "v5lite" in kind or "v5e" in kind:   # v5e
        return 384, 1024, 100 * 1024 * 1024, False
    if "7" in kind:                                   # TPU7x: 64 MiB VMEM/TC
        return 512, 512, 52 * 1024 * 1024, True
    if vmem is not None and vmem <= 80 * 1024 * 1024:  # small-VMEM unknown chip
        return 512, 512, 48 * 1024 * 1024, True
    return 512, 512, 64 * 1024 * 1024, False          # conservative fallback


def mlp_head_kernel(x_ref, w1_ref, b1_ref, w2_ref, b2_ref, w3_ref, b3_ref,
                    o_ref, acc_ref):
    """One (tile_m, block_k) step of the fused 3-layer MLP.

    Per k step: compute the layer-1 hidden chunk this step needs and fold its
    layer-2 partial product into the resident f32 accumulator; on the last
    step run a chunked bias+GELU+output-projection epilogue.
    """
    k = pl.program_id(1)
    nk = pl.num_programs(1)

    # Layer 1 chunk: (tile_m, in) @ (in, block_k), bias + GELU in f32.
    h1 = jnp.dot(x_ref[...], w1_ref[...], preferred_element_type=jnp.float32)
    h1 = _gelu_exact(h1 + b1_ref[...])

    # Layer 2 partial: (tile_m, block_k) @ (block_k, hid), f32 accumulation.
    partial = jnp.dot(h1.astype(w2_ref.dtype), w2_ref[...],
                      preferred_element_type=jnp.float32)

    # Assign on the first k step (no zero-fill + no read-modify-write sweep of
    # the (tile_m, hid) f32 accumulator); accumulate on the rest.
    @pl.when(k == 0)
    def _assign():
        acc_ref[...] = partial

    @pl.when(k != 0)
    def _accumulate():
        acc_ref[...] += partial

    @pl.when(k == nk - 1)
    def _finalize():
        # Chunked epilogue over the hidden dimension: bounded temporaries and
        # GELU (VALU/EUP) overlapped with the W3 MXU work of the previous chunk.
        blk = w2_ref.shape[0]                 # == block_k (static)
        n_chunks = acc_ref.shape[1] // blk    # == hid_pad // block_k (static)
        m = acc_ref.shape[0]
        n_out = o_ref.shape[1]

        def body(c, out_acc):
            start = pl.multiple_of(c * blk, blk)
            h2 = _gelu_exact(acc_ref[:, pl.ds(start, blk)]
                             + b2_ref[:, pl.ds(start, blk)])
            return out_acc + jnp.dot(h2.astype(w3_ref.dtype),
                                     w3_ref[pl.ds(start, blk), :],
                                     preferred_element_type=jnp.float32)

        out_acc = lax.fori_loop(0, n_chunks, body,
                                jnp.zeros((m, n_out), jnp.float32))
        o_ref[...] = (out_acc + b3_ref[...]).astype(o_ref.dtype)


@functools.partial(
    jax.jit,
    static_argnames=("tile_m", "block_k", "vmem_limit_bytes",
                     "two_batch_tiles", "single_buffer", "compute_dtype"))
def _mlp_head_impl(x, w1, b1, w2, b2, w3, b3, *, tile_m, block_k,
                   vmem_limit_bytes, two_batch_tiles, single_buffer,
                   compute_dtype):
    """x: (B, in_dim); wI: (fan_in, fan_out) [pre-transposed]; bI: (1, fan_out)."""
    B, in_dim = x.shape
    hid = w1.shape[1]
    out_dim = w3.shape[1]
    out_dtype = x.dtype

    b1 = b1.reshape(1, -1)
    b2 = b2.reshape(1, -1)
    b3 = b3.reshape(1, -1)

    # ---- alignment / padding (all static Python ints) ----------------------
    tile_m = min(tile_m, _round_up(B, 8))
    if two_batch_tiles and B >= 512:
        # 2-TensorCore chips: guarantee >=2 batch tiles so the "parallel" axis
        # actually uses both cores, while each tile keeps >=256 rows.
        tile_m = min(tile_m, _round_up((B + 1) // 2, 8))
    B_pad = _round_up(B, tile_m)
    in_pad = _round_up(in_dim, 128)
    hid_128 = _round_up(hid, 128)
    block_k = _round_up(min(block_k, hid_128), 128)
    hid_pad = _round_up(hid, block_k)
    out_pad = _round_up(out_dim, 128)

    def pad2(a, rows, cols, dtype):
        return jnp.pad(a.astype(dtype),
                       ((0, rows - a.shape[0]), (0, cols - a.shape[1])))

    # bf16 operands for the MXU; biases stay f32 (added post-matmul).
    x_p = pad2(x, B_pad, in_pad, compute_dtype)
    w1_p = pad2(w1, in_pad, hid_pad, compute_dtype)
    w2_p = pad2(w2, hid_pad, hid_pad, compute_dtype)
    w3_p = pad2(w3, hid_pad, out_pad, compute_dtype)
    b1_p = pad2(b1, 1, hid_pad, jnp.float32)
    b2_p = pad2(b2, 1, hid_pad, jnp.float32)
    b3_p = pad2(b3, 1, out_pad, jnp.float32)

    n_btiles = B_pad // tile_m
    grid = (n_btiles, hid_pad // block_k)

    # W1/b1/W2 are re-streamed once per batch tile; x is read once overall;
    # W3/b2/b3 have constant block indices and are fetched once.
    streamed = sum(int(a.size) * a.dtype.itemsize for a in (w1_p, b1_p, w2_p))
    resident = sum(int(a.size) * a.dtype.itemsize
                   for a in (x_p, w3_p, b2_p, b3_p))
    bytes_accessed = (n_btiles * streamed + resident
                      + B_pad * out_pad * jnp.dtype(out_dtype).itemsize)
    cost = pl.CostEstimate(
        flops=2 * B_pad * (in_pad * hid_pad + hid_pad * hid_pad
                           + hid_pad * out_pad),
        transcendentals=2 * B_pad * hid_pad,   # two GELUs on (B, hid)
        bytes_accessed=bytes_accessed,
    )

    def spec(shape, index_map, *, single=False):
        # Constant-index operands never use their second pipeline buffer;
        # single-buffering them frees VMEM for larger tiles (most valuable on
        # v7x's 64 MiB budget).
        if single and single_buffer and _HAS_SINGLE_BUFFER:
            return pl.BlockSpec(shape, index_map, pipeline_mode=pl.Buffered(1))
        return pl.BlockSpec(shape, index_map)

    out_p = pl.pallas_call(
        mlp_head_kernel,
        out_shape=jax.ShapeDtypeStruct((B_pad, out_pad), out_dtype),
        grid_spec=pltpu.PrefetchScalarGridSpec(
            num_scalar_prefetch=0,
            grid=grid,
            in_specs=[
                spec((tile_m, in_pad), lambda i, k: (i, 0), single=True),    # x
                spec((in_pad, block_k), lambda i, k: (0, k)),                # W1
                spec((1, block_k), lambda i, k: (0, k)),                     # b1
                spec((block_k, hid_pad), lambda i, k: (k, 0)),               # W2
                spec((1, hid_pad), lambda i, k: (0, 0), single=True),        # b2
                spec((hid_pad, out_pad), lambda i, k: (0, 0), single=True),  # W3
                spec((1, out_pad), lambda i, k: (0, 0), single=True),        # b3
            ],
            out_specs=pl.BlockSpec((tile_m, out_pad), lambda i, k: (i, 0)),
            scratch_shapes=[pltpu.VMEM((tile_m, hid_pad), jnp.float32)],
        ),
        compiler_params=pltpu.CompilerParams(
            dimension_semantics=("parallel", "arbitrary"),
            vmem_limit_bytes=vmem_limit_bytes,
        ),
        cost_estimate=cost,
    )(x_p, w1_p, b1_p, w2_p, b2_p, w3_p, b3_p)

    return out_p[:B, :out_dim]


def mlp_head(x, w1, b1, w2, b2, w3, b3, *, tile_m=None, block_k=None,
             vmem_limit_bytes=None, compute_dtype=jnp.bfloat16):
    """Front wrapper: picks generation-specific tiling, falls back gracefully
    if single-buffered BlockSpecs are not supported by this jax version."""
    d_tile_m, d_block_k, d_vmem, two_tiles = _chip_defaults()
    kwargs = dict(
        tile_m=int(tile_m if tile_m is not None else d_tile_m),
        block_k=int(block_k if block_k is not None else d_block_k),
        vmem_limit_bytes=int(vmem_limit_bytes if vmem_limit_bytes is not None
                             else d_vmem),
        two_batch_tiles=bool(two_tiles),
        compute_dtype=compute_dtype,
    )
    if _HAS_SINGLE_BUFFER:
        try:
            return _mlp_head_impl(x, w1, b1, w2, b2, w3, b3,
                                  single_buffer=True, **kwargs)
        except Exception:
            # pl.Buffered(1) rejected by this jax/Mosaic build -> default bufs.
            pass
    return _mlp_head_impl(x, w1, b1, w2, b2, w3, b3,
                          single_buffer=False, **kwargs)


def xavier_uniform(key, fan_in, fan_out, dtype=jnp.float32):
    # torch.nn.init.xavier_uniform_ on a (out, in) weight -> same bound.
    bound = math.sqrt(6.0 / (fan_in + fan_out))
    # Return already-transposed (in, out) layout for the kernel.
    return jax.random.uniform(key, (fan_in, fan_out), dtype=dtype,
                              minval=-bound, maxval=bound)


def mlp_head_reference(x, w1, b1, w2, b2, w3, b3, compute_dtype=jnp.bfloat16):
    """Pure-JAX reference with the same bf16-input / f32-accum numerics."""
    cd = compute_dtype
    h = _gelu_exact(jnp.dot(x.astype(cd), w1.astype(cd),
                            preferred_element_type=jnp.float32) + b1)
    h = _gelu_exact(jnp.dot(h.astype(cd), w2.astype(cd),
                            preferred_element_type=jnp.float32) + b2)
    return jnp.dot(h.astype(cd), w3.astype(cd),
                   preferred_element_type=jnp.float32) + b3


if __name__ == "__main__":
    # Small shapes consistent with the module: batch=16, in_dim=32,
    # hidden_dim=256 (small stand-in for the default 8124), out_dim=16,
    # nlayers=3, use_bn=False.
    B, in_dim, hidden_dim, out_dim = 16, 32, 256, 16

    key = jax.random.PRNGKey(0)
    kx, k1, k2, k3 = jax.random.split(key, 4)

    x = jax.random.normal(kx, (B, in_dim), dtype=jnp.float32)

    w1 = xavier_uniform(k1, in_dim, hidden_dim)
    b1 = jnp.zeros((1, hidden_dim), jnp.float32)   # nn.init.constant_(bias, 0)
    w2 = xavier_uniform(k2, hidden_dim, hidden_dim)
    b2 = jnp.zeros((1, hidden_dim), jnp.float32)
    w3 = xavier_uniform(k3, hidden_dim, out_dim)
    b3 = jnp.zeros((1, out_dim), jnp.float32)

    ref = mlp_head_reference(x, w1, b1, w2, b2, w3, b3,
                             compute_dtype=jnp.bfloat16)

    # 1) Chip-default tiling path (single k step at this tiny hidden size).
    out_default = mlp_head(x, w1, b1, w2, b2, w3, b3)
    out_default = jax.block_until_ready(out_default)
    assert out_default.shape == (B, out_dim)
    err0 = float(jnp.max(jnp.abs(out_default - ref)))
    assert jnp.allclose(out_default, ref, atol=1e-2, rtol=1e-2), \
        f"default-tiling mismatch vs JAX reference (max abs err {err0})"

    # 2) block_k=128 so the demo exercises the K-streaming / accumulator path
    #    and the chunked finalize (hid_pad=256 -> 2 reduction steps, 2 chunks).
    out = mlp_head(x, w1, b1, w2, b2, w3, b3, tile_m=256, block_k=128)
    out = jax.block_until_ready(out)
    assert out.shape == (B, out_dim)
    err1 = float(jnp.max(jnp.abs(out - ref)))
    assert jnp.allclose(out, ref, atol=1e-2, rtol=1e-2), \
        f"streamed-tiling mismatch vs JAX reference (max abs err {err1})"

    print("KERNEL_OK")
</pallas_src>

<mosaic_0001>
module attributes {stable_mosaic.version = 11 : i64} {
  func.func @mlp_head_kernel(%arg0: i32, %arg1: i32, %arg2: memref<16x128xbf16, #tpu.memory_space<vmem>>, %arg3: memref<128x256xbf16, #tpu.memory_space<vmem>>, %arg4: memref<1x256xf32, #tpu.memory_space<vmem>>, %arg5: memref<256x256xbf16, #tpu.memory_space<vmem>>, %arg6: memref<1x256xf32, #tpu.memory_space<vmem>>, %arg7: memref<256x128xbf16, #tpu.memory_space<vmem>>, %arg8: memref<1x128xf32, #tpu.memory_space<vmem>>, %arg9: memref<16x128xf32, #tpu.memory_space<vmem>>, %arg10: memref<16x256xf32, #tpu.memory_space<vmem>>) attributes {dimension_semantics = [#tpu.dimension_semantics<parallel>, #tpu.dimension_semantics<arbitrary>], iteration_bounds = array<i64: 1, 1>, scalar_prefetch = 0 : i64, scratch_operands = 1 : i64, tpu.core_type = #tpu.core_type<tc>, window_params = [{pipeline_mode = #tpu.pipeline_mode<synchronous>, transform_indices = @transform_0, window_bounds = array<i64: 16, 128>}, {transform_indices = @transform_1, window_bounds = array<i64: 128, 256>}, {transform_indices = @transform_2, window_bounds = array<i64: 1, 256>}, {transform_indices = @transform_3, window_bounds = array<i64: 256, 256>}, {pipeline_mode = #tpu.pipeline_mode<synchronous>, transform_indices = @transform_4, window_bounds = array<i64: 1, 256>}, {pipeline_mode = #tpu.pipeline_mode<synchronous>, transform_indices = @transform_5, window_bounds = array<i64: 256, 128>}, {pipeline_mode = #tpu.pipeline_mode<synchronous>, transform_indices = @transform_6, window_bounds = array<i64: 1, 128>}, {transform_indices = @transform_7, window_bounds = array<i64: 16, 128>}]} {
    %c0 = arith.constant 0 : index
    %c0_0 = arith.constant 0 : index
    %0 = vector.load %arg2[%c0, %c0_0] : memref<16x128xbf16, #tpu.memory_space<vmem>>, vector<16x128xbf16>
    %c0_1 = arith.constant 0 : index
    %c0_2 = arith.constant 0 : index
    %1 = vector.load %arg3[%c0_1, %c0_2] : memref<128x256xbf16, #tpu.memory_space<vmem>>, vector<128x256xbf16>
    %cst = arith.constant dense<0.000000e+00> : vector<16x256xf32>
    %2 = tpu.matmul %0, %1, %cst {dimension_numbers = #tpu.dot_dimension_numbers<[1], [0], [0], [1], [0, 0, 1, 1], [], []>} : vector<16x128xbf16>, vector<128x256xbf16>, vector<16x256xf32> -> vector<16x256xf32>
    %c0_3 = arith.constant 0 : index
    %c0_4 = arith.constant 0 : index
    %3 = vector.load %arg4[%c0_3, %c0_4] : memref<1x256xf32, #tpu.memory_space<vmem>>, vector<1x256xf32>
    %4 = vector.broadcast %3 : vector<1x256xf32> to vector<16x256xf32>
    %5 = arith.addf %2, %4 : vector<16x256xf32>
    %cst_5 = arith.constant 5.000000e-01 : f32
    %6 = vector.broadcast %cst_5 : f32 to vector<16x256xf32>
    %7 = arith.mulf %6, %5 : vector<16x256xf32>
    %cst_6 = arith.constant 0.707106769 : f32
    %8 = vector.broadcast %cst_6 : f32 to vector<16x256xf32>
    %9 = arith.mulf %5, %8 : vector<16x256xf32>
    %10 = math.erf %9 : vector<16x256xf32>
    %cst_7 = arith.constant 1.000000e+00 : f32
    %11 = vector.broadcast %cst_7 : f32 to vector<16x256xf32>
    %12 = arith.addf %11, %10 : vector<16x256xf32>
    %13 = arith.mulf %7, %12 : vector<16x256xf32>
    %14 = arith.truncf %13 : vector<16x256xf32> to vector<16x256xbf16>
    %c0_8 = arith.constant 0 : index
    %c0_9 = arith.constant 0 : index
    %15 = vector.load %arg5[%c0_8, %c0_9] : memref<256x256xbf16, #tpu.memory_space<vmem>>, vector<256x256xbf16>
    %cst_10 = arith.constant dense<0.000000e+00> : vector<16x256xf32>
    %16 = tpu.matmul %14, %15, %cst_10 {dimension_numbers = #tpu.dot_dimension_numbers<[1], [0], [0], [1], [0, 0, 1, 1], [], []>} : vector<16x256xbf16>, vector<256x256xbf16>, vector<16x256xf32> -> vector<16x256xf32>
    %c0_i32 = arith.constant 0 : i32
    %17 = arith.cmpi eq, %arg1, %c0_i32 : i32
    %18 = arith.extui %17 : i1 to i32
    %c0_i32_11 = arith.constant 0 : i32
    %19 = arith.cmpi ne, %18, %c0_i32_11 : i32
    scf.if %19 {
      %c0_16 = arith.constant 0 : index
      %c0_17 = arith.constant 0 : index
      %26 = vector.load %arg10[%c0_16, %c0_17] : memref<16x256xf32, #tpu.memory_space<vmem>>, vector<16x256xf32>
      tpu.vector_store %arg10[%c0_16, %c0_17], %16 {strides = array<i32>} : memref<16x256xf32, #tpu.memory_space<vmem>>, vector<16x256xf32>,
    } else {
    }
    %c0_i32_12 = arith.constant 0 : i32
    %20 = arith.cmpi ne, %arg1, %c0_i32_12 : i32
    %21 = arith.extui %20 : i1 to i32
    %c0_i32_13 = arith.constant 0 : i32
    %22 = arith.cmpi ne, %21, %c0_i32_13 : i32
    scf.if %22 {
      %c0_16 = arith.constant 0 : index
      %c0_17 = arith.constant 0 : index
      %26 = vector.load %arg10[%c0_16, %c0_17] : memref<16x256xf32, #tpu.memory_space<vmem>>, vector<16x256xf32>
      %27 = arith.addf %26, %16 : vector<16x256xf32>
      %c0_18 = arith.constant 0 : index
      %c0_19 = arith.constant 0 : index
      %28 = vector.load %arg10[%c0_18, %c0_19] : memref<16x256xf32, #tpu.memory_space<vmem>>, vector<16x256xf32>
      tpu.vector_store %arg10[%c0_18, %c0_19], %27 {strides = array<i32>} : memref<16x256xf32, #tpu.memory_space<vmem>>, vector<16x256xf32>,
    } else {
    }
    %c0_i32_14 = arith.constant 0 : i32
    %23 = arith.cmpi eq, %arg1, %c0_i32_14 : i32
    %24 = arith.extui %23 : i1 to i32
    %c0_i32_15 = arith.constant 0 : i32
    %25 = arith.cmpi ne, %24, %c0_i32_15 : i32
    scf.if %25 {
      %cst_16 = arith.constant 0.000000e+00 : f32
      %26 = vector.broadcast %cst_16 : f32 to vector<16x128xf32>
      %c0_i32_17 = arith.constant 0 : i32
      %c256_i32 = arith.constant 256 : i32
      %27 = arith.muli %c0_i32_17, %c256_i32 : i32
      %28 = tpu.assume_multiple %27, 256 : i32
      %c0_18 = arith.constant 0 : index
      %29 = arith.index_cast %28 : i32 to index
      %30 = vector.load %arg10[%c0_18, %29] : memref<16x256xf32, #tpu.memory_space<vmem>>, vector<16x256xf32>
      %c0_19 = arith.constant 0 : index
      %31 = arith.index_cast %28 : i32 to index
      %32 = vector.load %arg6[%c0_19, %31] : memref<1x256xf32, #tpu.memory_space<vmem>>, vector<1x256xf32>
      %33 = vector.broadcast %32 : vector<1x256xf32> to vector<16x256xf32>
      %34 = arith.addf %30, %33 : vector<16x256xf32>
      %cst_20 = arith.constant 5.000000e-01 : f32
      %35 = vector.broadcast %cst_20 : f32 to vector<16x256xf32>
      %36 = arith.mulf %35, %34 : vector<16x256xf32>
      %cst_21 = arith.constant 0.707106769 : f32
      %37 = vector.broadcast %cst_21 : f32 to vector<16x256xf32>
      %38 = arith.mulf %34, %37 : vector<16x256xf32>
      %39 = math.erf %38 : vector<16x256xf32>
      %cst_22 = arith.constant 1.000000e+00 : f32
      %40 = vector.broadcast %cst_22 : f32 to vector<16x256xf32>
      %41 = arith.addf %40, %39 : vector<16x256xf32>
      %42 = arith.mulf %36, %41 : vector<16x256xf32>
      %43 = arith.truncf %42 : vector<16x256xf32> to vector<16x256xbf16>
      %44 = arith.index_cast %28 : i32 to index
      %c0_23 = arith.constant 0 : index
      %45 = vector.load %arg7[%44, %c0_23] : memref<256x128xbf16, #tpu.memory_space<vmem>>, vector<256x128xbf16>
      %cst_24 = arith.constant dense<0.000000e+00> : vector<16x128xf32>
      %46 = tpu.matmul %43, %45, %cst_24 {dimension_numbers = #tpu.dot_dimension_numbers<[1], [0], [0], [1], [0, 0, 1, 1], [], []>} : vector<16x256xbf16>, vector<256x128xbf16>, vector<16x128xf32> -> vector<16x128xf32>
      %47 = arith.addf %26, %46 : vector<16x128xf32>
      %c1_i32 = arith.constant 1 : i32
      %c0_25 = arith.constant 0 : index
      %c0_26 = arith.constant 0 : index
      %48 = vector.load %arg8[%c0_25, %c0_26] : memref<1x128xf32, #tpu.memory_space<vmem>>, vector<1x128xf32>
      %49 = vector.broadcast %48 : vector<1x128xf32> to vector<16x128xf32>
      %50 = arith.addf %47, %49 : vector<16x128xf32>
      %c0_27 = arith.constant 0 : index
      %c0_28 = arith.constant 0 : index
      %51 = vector.load %arg9[%c0_27, %c0_28] : memref<16x128xf32, #tpu.memory_space<vmem>>, vector<16x128xf32>
      tpu.vector_store %arg9[%c0_27, %c0_28], %50 {strides = array<i32>} : memref<16x128xf32, #tpu.memory_space<vmem>>, vector<16x128xf32>,
    } else {
    }
    return
  }
  func.func @transform_0(%arg0: i32, %arg1: i32) -> (i32, i32) {
    %c0_i32 = arith.constant 0 : i32
    %c0_i32_0 = arith.constant 0 : i32
    return %arg0, %c0_i32 : i32, i32
  }
  func.func @transform_1(%arg0: i32, %arg1: i32) -> (i32, i32) {
    %c0_i32 = arith.constant 0 : i32
    %c0_i32_0 = arith.constant 0 : i32
    return %c0_i32, %arg1 : i32, i32
  }
  func.func @transform_2(%arg0: i32, %arg1: i32) -> (i32, i32) {
    %c0_i32 = arith.constant 0 : i32
    %c0_i32_0 = arith.constant 0 : i32
    return %c0_i32, %arg1 : i32, i32
  }
  func.func @transform_3(%arg0: i32, %arg1: i32) -> (i32, i32) {
    %c0_i32 = arith.constant 0 : i32
    %c0_i32_0 = arith.constant 0 : i32
    return %arg1, %c0_i32 : i32, i32
  }
  func.func @transform_4(%arg0: i32, %arg1: i32) -> (i32, i32) {
    %c0_i32 = arith.constant 0 : i32
    %c0_i32_0 = arith.constant 0 : i32
    %c0_i32_1 = arith.constant 0 : i32
    return %c0_i32, %c0_i32_0 : i32, i32
  }
  func.func @transform_5(%arg0: i32, %arg1: i32) -> (i32, i32) {
    %c0_i32 = arith.constant 0 : i32
    %c0_i32_0 = arith.constant 0 : i32
    %c0_i32_1 = arith.constant 0 : i32
    return %c0_i32, %c0_i32_0 : i32, i32
  }
  func.func @transform_6(%arg0: i32, %arg1: i32) -> (i32, i32) {
    %c0_i32 = arith.constant 0 : i32
    %c0_i32_0 = arith.constant 0 : i32
    %c0_i32_1 = arith.constant 0 : i32
    return %c0_i32, %c0_i32_0 : i32, i32
  }
  func.func @transform_7(%arg0: i32, %arg1: i32) -> (i32, i32) {
    %c0_i32 = arith.constant 0 : i32
    %c0_i32_0 = arith.constant 0 : i32
    return %arg0, %c0_i32 : i32, i32
  }
}

module attributes {stable_mosaic.version = 11 : i64} {
  func.func @mlp_head_kernel(%arg0: i32, %arg1: i32, %arg2: memref<16x128xbf16, #tpu.memory_space<vmem>>, %arg3: memref<128x256xbf16, #tpu.memory_space<vmem>>, %arg4: memref<1x256xf32, #tpu.memory_space<vmem>>, %arg5: memref<256x256xbf16, #tpu.memory_space<vmem>>, %arg6: memref<1x256xf32, #tpu.memory_space<vmem>>, %arg7: memref<256x128xbf16, #tpu.memory_space<vmem>>, %arg8: memref<1x128xf32, #tpu.memory_space<vmem>>, %arg9: memref<16x128xf32, #tpu.memory_space<vmem>>, %arg10: memref<16x256xf32, #tpu.memory_space<vmem>>) attributes {dimension_semantics = [#tpu.dimension_semantics<parallel>, #tpu.dimension_semantics<arbitrary>], iteration_bounds = array<i64: 1, 1>, scalar_prefetch = 0 : i64, scratch_operands = 1 : i64, tpu.core_type = #tpu.core_type<tc>, window_params = [{transform_indices = @transform_0, window_bounds = array<i64: 16, 128>}, {transform_indices = @transform_1, window_bounds = array<i64: 128, 256>}, {transform_indices = @transform_2, window_bounds = array<i64: 1, 256>}, {transform_indices = @transform_3, window_bounds = array<i64: 256, 256>}, {pipeline_mode = #tpu.pipeline_mode<synchronous>, transform_indices = @transform_4, window_bounds = array<i64: 1, 256>}, {pipeline_mode = #tpu.pipeline_mode<synchronous>, transform_indices = @transform_5, window_bounds = array<i64: 256, 128>}, {pipeline_mode = #tpu.pipeline_mode<synchronous>, transform_indices = @transform_6, window_bounds = array<i64: 1, 128>}, {transform_indices = @transform_7, window_bounds = array<i64: 16, 128>}]} {
    %c0 = arith.constant 0 : index
    %c0_0 = arith.constant 0 : index
    %0 = vector.load %arg2[%c0, %c0_0] : memref<16x128xbf16, #tpu.memory_space<vmem>>, vector<16x128xbf16>
    %c0_1 = arith.constant 0 : index
    %c0_2 = arith.constant 0 : index
    %1 = vector.load %arg3[%c0_1, %c0_2] : memref<128x256xbf16, #tpu.memory_space<vmem>>, vector<128x256xbf16>
    %cst = arith.constant dense<0.000000e+00> : vector<16x256xf32>
    %2 = tpu.matmul %0, %1, %cst {dimension_numbers = #tpu.dot_dimension_numbers<[1], [0], [0], [1], [0, 0, 1, 1], [], []>} : vector<16x128xbf16>, vector<128x256xbf16>, vector<16x256xf32> -> vector<16x256xf32>
    %c0_3 = arith.constant 0 : index
    %c0_4 = arith.constant 0 : index
    %3 = vector.load %arg4[%c0_3, %c0_4] : memref<1x256xf32, #tpu.memory_space<vmem>>, vector<1x256xf32>
    %4 = vector.broadcast %3 : vector<1x256xf32> to vector<16x256xf32>
    %5 = arith.addf %2, %4 : vector<16x256xf32>
    %cst_5 = arith.constant 5.000000e-01 : f32
    %6 = vector.broadcast %cst_5 : f32 to vector<16x256xf32>
    %7 = arith.mulf %6, %5 : vector<16x256xf32>
    %cst_6 = arith.constant 0.707106769 : f32
    %8 = vector.broadcast %cst_6 : f32 to vector<16x256xf32>
    %9 = arith.mulf %5, %8 : vector<16x256xf32>
    %10 = math.erf %9 : vector<16x256xf32>
    %cst_7 = arith.constant 1.000000e+00 : f32
    %11 = vector.broadcast %cst_7 : f32 to vector<16x256xf32>
    %12 = arith.addf %11, %10 : vector<16x256xf32>
    %13 = arith.mulf %7, %12 : vector<16x256xf32>
    %14 = arith.truncf %13 : vector<16x256xf32> to vector<16x256xbf16>
    %c0_8 = arith.constant 0 : index
    %c0_9 = arith.constant 0 : index
    %15 = vector.load %arg5[%c0_8, %c0_9] : memref<256x256xbf16, #tpu.memory_space<vmem>>, vector<256x256xbf16>
    %cst_10 = arith.constant dense<0.000000e+00> : vector<16x256xf32>
    %16 = tpu.matmul %14, %15, %cst_10 {dimension_numbers = #tpu.dot_dimension_numbers<[1], [0], [0], [1], [0, 0, 1, 1], [], []>} : vector<16x256xbf16>, vector<256x256xbf16>, vector<16x256xf32> -> vector<16x256xf32>
    %c0_i32 = arith.constant 0 : i32
    %17 = arith.cmpi eq, %arg1, %c0_i32 : i32
    %18 = arith.extui %17 : i1 to i32
    %c0_i32_11 = arith.constant 0 : i32
    %19 = arith.cmpi ne, %18, %c0_i32_11 : i32
    scf.if %19 {
      %c0_16 = arith.constant 0 : index
      %c0_17 = arith.constant 0 : index
      %26 = vector.load %arg10[%c0_16, %c0_17] : memref<16x256xf32, #tpu.memory_space<vmem>>, vector<16x256xf32>
      tpu.vector_store %arg10[%c0_16, %c0_17], %16 {strides = array<i32>} : memref<16x256xf32, #tpu.memory_space<vmem>>, vector<16x256xf32>,
    } else {
    }
    %c0_i32_12 = arith.constant 0 : i32
    %20 = arith.cmpi ne, %arg1, %c0_i32_12 : i32
    %21 = arith.extui %20 : i1 to i32
    %c0_i32_13 = arith.constant 0 : i32
    %22 = arith.cmpi ne, %21, %c0_i32_13 : i32
    scf.if %22 {
      %c0_16 = arith.constant 0 : index
      %c0_17 = arith.constant 0 : index
      %26 = vector.load %arg10[%c0_16, %c0_17] : memref<16x256xf32, #tpu.memory_space<vmem>>, vector<16x256xf32>
      %27 = arith.addf %26, %16 : vector<16x256xf32>
      %c0_18 = arith.constant 0 : index
      %c0_19 = arith.constant 0 : index
      %28 = vector.load %arg10[%c0_18, %c0_19] : memref<16x256xf32, #tpu.memory_space<vmem>>, vector<16x256xf32>
      tpu.vector_store %arg10[%c0_18, %c0_19], %27 {strides = array<i32>} : memref<16x256xf32, #tpu.memory_space<vmem>>, vector<16x256xf32>,
    } else {
    }
    %c0_i32_14 = arith.constant 0 : i32
    %23 = arith.cmpi eq, %arg1, %c0_i32_14 : i32
    %24 = arith.extui %23 : i1 to i32
    %c0_i32_15 = arith.constant 0 : i32
    %25 = arith.cmpi ne, %24, %c0_i32_15 : i32
    scf.if %25 {
      %cst_16 = arith.constant 0.000000e+00 : f32
      %26 = vector.broadcast %cst_16 : f32 to vector<16x128xf32>
      %c0_i32_17 = arith.constant 0 : i32
      %c256_i32 = arith.constant 256 : i32
      %27 = arith.muli %c0_i32_17, %c256_i32 : i32
      %28 = tpu.assume_multiple %27, 256 : i32
      %c0_18 = arith.constant 0 : index
      %29 = arith.index_cast %28 : i32 to index
      %30 = vector.load %arg10[%c0_18, %29] : memref<16x256xf32, #tpu.memory_space<vmem>>, vector<16x256xf32>
      %c0_19 = arith.constant 0 : index
      %31 = arith.index_cast %28 : i32 to index
      %32 = vector.load %arg6[%c0_19, %31] : memref<1x256xf32, #tpu.memory_space<vmem>>, vector<1x256xf32>
      %33 = vector.broadcast %32 : vector<1x256xf32> to vector<16x256xf32>
      %34 = arith.addf %30, %33 : vector<16x256xf32>
      %cst_20 = arith.constant 5.000000e-01 : f32
      %35 = vector.broadcast %cst_20 : f32 to vector<16x256xf32>
      %36 = arith.mulf %35, %34 : vector<16x256xf32>
      %cst_21 = arith.constant 0.707106769 : f32
      %37 = vector.broadcast %cst_21 : f32 to vector<16x256xf32>
      %38 = arith.mulf %34, %37 : vector<16x256xf32>
      %39 = math.erf %38 : vector<16x256xf32>
      %cst_22 = arith.constant 1.000000e+00 : f32
      %40 = vector.broadcast %cst_22 : f32 to vector<16x256xf32>
      %41 = arith.addf %40, %39 : vector<16x256xf32>
      %42 = arith.mulf %36, %41 : vector<16x256xf32>
      %43 = arith.truncf %42 : vector<16x256xf32> to vector<16x256xbf16>
      %44 = arith.index_cast %28 : i32 to index
      %c0_23 = arith.constant 0 : index
      %45 = vector.load %arg7[%44, %c0_23] : memref<256x128xbf16, #tpu.memory_space<vmem>>, vector<256x128xbf16>
      %cst_24 = arith.constant dense<0.000000e+00> : vector<16x128xf32>
      %46 = tpu.matmul %43, %45, %cst_24 {dimension_numbers = #tpu.dot_dimension_numbers<[1], [0], [0], [1], [0, 0, 1, 1], [], []>} : vector<16x256xbf16>, vector<256x128xbf16>, vector<16x128xf32> -> vector<16x128xf32>
      %47 = arith.addf %26, %46 : vector<16x128xf32>
      %c1_i32 = arith.constant 1 : i32
      %c0_25 = arith.constant 0 : index
      %c0_26 = arith.constant 0 : index
      %48 = vector.load %arg8[%c0_25, %c0_26] : memref<1x128xf32, #tpu.memory_space<vmem>>, vector<1x128xf32>
      %49 = vector.broadcast %48 : vector<1x128xf32> to vector<16x128xf32>
      %50 = arith.addf %47, %49 : vector<16x128xf32>
      %c0_27 = arith.constant 0 : index
      %c0_28 = arith.constant 0 : index
      %51 = vector.load %arg9[%c0_27, %c0_28] : memref<16x128xf32, #tpu.memory_space<vmem>>, vector<16x128xf32>
      tpu.vector_store %arg9[%c0_27, %c0_28], %50 {strides = array<i32>} : memref<16x128xf32, #tpu.memory_space<vmem>>, vector<16x128xf32>,
    } else {
    }
    return
  }
  func.func @transform_0(%arg0: i32, %arg1: i32) -> (i32, i32) {
    %c0_i32 = arith.constant 0 : i32
    %c0_i32_0 = arith.constant 0 : i32
    return %arg0, %c0_i32 : i32, i32
  }
  func.func @transform_1(%arg0: i32, %arg1: i32) -> (i32, i32) {
    %c0_i32 = arith.constant 0 : i32
    %c0_i32_0 = arith.constant 0 : i32
    return %c0_i32, %arg1 : i32, i32
  }
  func.func @transform_2(%arg0: i32, %arg1: i32) -> (i32, i32) {
    %c0_i32 = arith.constant 0 : i32
    %c0_i32_0 = arith.constant 0 : i32
    return %c0_i32, %arg1 : i32, i32
  }
  func.func @transform_3(%arg0: i32, %arg1: i32) -> (i32, i32) {
    %c0_i32 = arith.constant 0 : i32
    %c0_i32_0 = arith.constant 0 : i32
    return %arg1, %c0_i32 : i32, i32
  }
  func.func @transform_4(%arg0: i32, %arg1: i32) -> (i32, i32) {
    %c0_i32 = arith.constant 0 : i32
    %c0_i32_0 = arith.constant 0 : i32
    %c0_i32_1 = arith.constant 0 : i32
    return %c0_i32, %c0_i32_0 : i32, i32
  }
  func.func @transform_5(%arg0: i32, %arg1: i32) -> (i32, i32) {
    %c0_i32 = arith.constant 0 : i32
    %c0_i32_0 = arith.constant 0 : i32
    %c0_i32_1 = arith.constant 0 : i32
    return %c0_i32, %c0_i32_0 : i32, i32
  }
  func.func @transform_6(%arg0: i32, %arg1: i32) -> (i32, i32) {
    %c0_i32 = arith.constant 0 : i32
    %c0_i32_0 = arith.constant 0 : i32
    %c0_i32_1 = arith.constant 0 : i32
    return %c0_i32, %c0_i32_0 : i32, i32
  }
  func.func @transform_7(%arg0: i32, %arg1: i32) -> (i32, i32) {
    %c0_i32 = arith.constant 0 : i32
    %c0_i32_0 = arith.constant 0 : i32
    return %arg0, %c0_i32 : i32, i32
  }
}

</mosaic_0001>

<bundles_post_ra>
// kernel: _mlp_head_impl.1
= control target key start
LH: loop header
LB: loop body
LE: loop exit
PB: predicated region body
PF: predicated region fallthrough
CT: control target
= control target key end

     0   :  { %v926_v2 = vmov 0   ;;  %s1189_s0 = inlined_call_operand.vmem [shape: bf16[16,128], index: 0, kind: input, shape index: {}]   ;;  %s1190_s1 = inlined_call_operand.vmem [shape: bf16[128,256], index: 1, kind: input, shape index: {}]   ;;  %s1191_s2 = inlined_call_operand.vmem [shape: f32[1,256], index: 2, kind: input, shape index: {}]   ;;  %s1192_s3 = inlined_call_operand.vmem [shape: bf16[256,256], index: 3, kind: input, shape index: {}]   ;;  %s1193_s4 = inlined_call_operand.vmem [shape: f32[1,256], index: 4, kind: input, shape index: {}]   ;;  %s1194_s5 = inlined_call_operand.vmem [shape: bf16[256,128], index: 5, kind: input, shape index: {}]   ;;  %s1195_s6 = inlined_call_operand.vmem [shape: f32[1,128], index: 6, kind: input, shape index: {}]   ;;  %s1196_s7 = inlined_call_operand.hbm [shape: f32[16,128], index: 7, kind: output, shape index: {}]  }
   0x1   :  { %v799_v0 = vld [vmem:[%s1190_s1 + $0x74] ss:$8 sps:$4 sm:$0xff]   ;;  %v801_v1 = vld [vmem:[%s1190_s1 + $0x70] ss:$8 sps:$4 sm:$0xff]   ;;  %176 = vmatprep.mubr.bf16.mxu0 %v926_v2  ;;  %v802_v3 = vld [vmem:[%s1190_s1 + $0x64] ss:$8 sps:$4 sm:$0xff]  }
   0x2   :  { %144 = vmatprep.subr.bf16.mxu0 %v799_v0  ;;  %v804_v4 = vld [vmem:[%s1190_s1 + $0x60] ss:$8 sps:$4 sm:$0xff]   ;;  %v805_v5 = vld [vmem:[%s1190_s1 + $0x54] ss:$8 sps:$4 sm:$0xff]   ;;  %v807_v6 = vld [vmem:[%s1190_s1 + $0x50] ss:$8 sps:$4 sm:$0xff]  }
   0x3   :  { %145 = vmatpush1.bf16.msra.mxu0 %v801_v1  ;;  %v808_v7 = vld [vmem:[%s1190_s1 + $0x44] ss:$8 sps:$4 sm:$0xff]   ;;  %v810_v8 = vld [vmem:[%s1190_s1 + $0x40] ss:$8 sps:$4 sm:$0xff]   ;;  %v811_v9 = vld [vmem:[%s1190_s1 + $0x34] ss:$8 sps:$4 sm:$0xff]  }
   0x4   :  { %146 = vmatprep.subr.bf16.mxu0 %v802_v3  ;;  %v824_v10 = vld [vmem:[%s1192_s3 + $0x74] ss:$8 sps:$4 sm:$0xff]   ;;  %v826_v11 = vld [vmem:[%s1192_s3 + $0x70] ss:$8 sps:$4 sm:$0xff]   ;;  %v827_v12 = vld [vmem:[%s1192_s3 + $0x64] ss:$8 sps:$4 sm:$0xff]  }
   0x5   :  { %401 = vmatprep.subr.bf16.mxu1 %v824_v10  ;;  %v813_v13 = vld [vmem:[%s1190_s1 + $0x30] ss:$8 sps:$4 sm:$0xff]   ;;  %v829_v14 = vld [vmem:[%s1192_s3 + $0x60] ss:$8 sps:$4 sm:$0xff]   ;;  %v814_v15 = vld [vmem:[%s1190_s1 + $0x24] ss:$8 sps:$4 sm:$0xff]  }
   0x6   :  { %402 = vmatpush1.bf16.msra.mxu1 %v826_v11  ;;  %v830_v16 = vld [vmem:[%s1192_s3 + $0x54] ss:$8 sps:$4 sm:$0xff]   ;;  %v816_v17 = vld [vmem:[%s1190_s1 + $0x20] ss:$8 sps:$4 sm:$0xff]   ;;  %v832_v18 = vld [vmem:[%s1192_s3 + $0x50] ss:$8 sps:$4 sm:$0xff]  }
   0x7   :  { %147 = vmatpush1.bf16.msra.mxu0 %v804_v4  ;;  %403 = vmatprep.subr.bf16.mxu1 %v827_v12  ;;  %v817_v19 = vld [vmem:[%s1190_s1 + $0x14] ss:$8 sps:$4 sm:$0xff]   ;;  %v833_v20 = vld [vmem:[%s1192_s3 + $0x44] ss:$8 sps:$4 sm:$0xff]   ;;  %v819_v21 = vld [vmem:[%s1190_s1 + $0x10] ss:$8 sps:$4 sm:$0xff]  }
   0x8   :  { %148 = vmatprep.subr.bf16.mxu0 %v805_v5  ;;  %v820_v22 = vld [vmem:[%s1190_s1 + $0x4] ss:$8 sps:$4 sm:$0xff]   ;;  %v835_v23 = vld [vmem:[%s1192_s3 + $0x40] ss:$8 sps:$4 sm:$0xff]   ;;  %v836_v24 = vld [vmem:[%s1192_s3 + $0x34] ss:$8 sps:$4 sm:$0xff]  }
   0x9   :  { %v822_v25 = vld [vmem:[%s1190_s1] ss:$8 sps:$4 sm:$0xff]   ;;  %v838_v26 = vld [vmem:[%s1192_s3 + $0x30] ss:$8 sps:$4 sm:$0xff]   ;;  %v839_v27 = vld [vmem:[%s1192_s3 + $0x24] ss:$8 sps:$4 sm:$0xff]  }
   0xa   :  { %404 = vmatpush1.bf16.msra.mxu1 %v829_v14  ;;  %v823_v28 = vld [vmem:[%s1189_s0] sm:$0xff]   ;;  %v842_v30 = vld [vmem:[%s1192_s3 + $0x14] ss:$8 sps:$4 sm:$0xff]   ;;  %v844_v31 = vld [vmem:[%s1192_s3 + $0x10] ss:$8 sps:$4 sm:$0xff]  }
   0xb   :  { %149 = vmatpush1.bf16.msra.mxu0 %v807_v6  ;;  %405 = vmatprep.subr.bf16.mxu1 %v830_v16  ;;  %v841_v29 = vld [vmem:[%s1192_s3 + $0x20] ss:$8 sps:$4 sm:$0xff]   ;;  %v845_v32 = vld [vmem:[%s1192_s3 + $0x4] ss:$8 sps:$4 sm:$0xff]  }
   0xc   :  { %150 = vmatprep.subr.bf16.mxu0 %v808_v7 }
   0xe   :  { %406 = vmatpush1.bf16.msra.mxu1 %v832_v18 }
   0xf   :  { %151 = vmatpush1.bf16.msra.mxu0 %v810_v8  ;;  %407 = vmatprep.subr.bf16.mxu1 %v833_v20 }
  0x10   :  { %152 = vmatprep.subr.bf16.mxu0 %v811_v9 }
  0x12   :  { %408 = vmatpush1.bf16.msra.mxu1 %v835_v23 }
  0x13   :  { %153 = vmatpush1.bf16.msra.mxu0 %v813_v13  ;;  %409 = vmatprep.subr.bf16.mxu1 %v836_v24 }
  0x14   :  { %154 = vmatprep.subr.bf16.mxu0 %v814_v15 }
  0x16   :  { %410 = vmatpush1.bf16.msra.mxu1 %v838_v26 }
  0x17   :  { %155 = vmatpush1.bf16.msra.mxu0 %v816_v17  ;;  %411 = vmatprep.subr.bf16.mxu1 %v839_v27 }
  0x18   :  { %156 = vmatprep.subr.bf16.mxu0 %v817_v19 }
  0x1a   :  { %412 = vmatpush1.bf16.msra.mxu1 %v841_v29 }
  0x1b   :  { %157 = vmatpush1.bf16.msra.mxu0 %v819_v21  ;;  %413 = vmatprep.subr.bf16.mxu1 %v842_v30 }
  0x1c   :  { %158 = vmatprep.subr.bf16.mxu0 %v820_v22 }
  0x1f   :  { %159 = vmatpush1.bf16.msra.mxu0 %v822_v25 }
  0x22   :  { %177 = vmatmul.mubr.bf16.vlgmr.msra.gmra.mxu0 %v823_v28 }
  0x23   :  { %12 = vsyncpa [#allocation4], 0  ;;  %414 = vmatpush1.bf16.msra.mxu1 %v844_v31  ;;  %v847_v33 = vld [vmem:[%s1192_s3] ss:$8 sps:$4 sm:$0xff]   ;;  %v848_v34 = vld [vmem:[%s1192_s3 + $0xf4] ss:$8 sps:$4 sm:$0xff]   ;;  %v48_v50 = vlaneseq }
  0x24   :  { %415 = vmatprep.subr.bf16.mxu1 %v845_v32  ;;  %v850_v35 = vld [vmem:[%s1192_s3 + $0xf0] ss:$8 sps:$4 sm:$0xff]   ;;  %v851_v36 = vld [vmem:[%s1192_s3 + $0xe4] ss:$8 sps:$4 sm:$0xff]   ;;  %v853_v37 = vld [vmem:[%s1192_s3 + $0xe0] ss:$8 sps:$4 sm:$0xff]  }
  0x25   :  { %v854_v38 = vld [vmem:[%s1192_s3 + $0xd4] ss:$8 sps:$4 sm:$0xff]   ;;  %v856_v39 = vld [vmem:[%s1192_s3 + $0xd0] ss:$8 sps:$4 sm:$0xff]   ;;  %v857_v40 = vld [vmem:[%s1192_s3 + $0xc4] ss:$8 sps:$4 sm:$0xff]  }
  0x26   :  { %v859_v41 = vld [vmem:[%s1192_s3 + $0xc0] ss:$8 sps:$4 sm:$0xff]   ;;  %v860_v42 = vld [vmem:[%s1192_s3 + $0xb4] ss:$8 sps:$4 sm:$0xff]   ;;  %v862_v43 = vld [vmem:[%s1192_s3 + $0xb0] ss:$8 sps:$4 sm:$0xff]  }
  0x27   :  { %416 = vmatpush1.bf16.msra.mxu1 %v847_v33  ;;  %v863_v44 = vld [vmem:[%s1192_s3 + $0xa4] ss:$8 sps:$4 sm:$0xff]   ;;  %v865_v45 = vld [vmem:[%s1192_s3 + $0xa0] ss:$8 sps:$4 sm:$0xff]   ;;  %v866_v46 = vld [vmem:[%s1192_s3 + $0x94] ss:$8 sps:$4 sm:$0xff]  }
  0x28   :  { %417 = vmatprep.subr.bf16.mxu1 %v848_v34  ;;  %v868_v47 = vld [vmem:[%s1192_s3 + $0x90] ss:$8 sps:$4 sm:$0xff]   ;;  %v869_v48 = vld [vmem:[%s1192_s3 + $0x84] ss:$8 sps:$4 sm:$0xff]   ;;  %v871_v49 = vld [vmem:[%s1192_s3 + $0x80] ss:$8 sps:$4 sm:$0xff]  }
  0x29   :  { %v1117_v51 = vshrl.u32 %v48_v50, 7  ;;  %v46_v53 = vld [vmem:[%s1191_s2] sm:$0x3]  ;;  %v872_v23 = vld [vmem:[%s1194_s5 + $0x78] sm:$0xff]   ;;  %v874_v25 = vld [vmem:[%s1194_s5 + $0x70] sm:$0xff]   ;;  %s927_s10 = smov [#allocation3]  }
  0x2a   :  { %v873_v24 = vld [vmem:[%s1194_s5 + $0x38] sm:$0xff]   ;;  %773 = vmatprep.subr.bf16.mxu0 %v872_v23  ;;  %v875_v26 = vld [vmem:[%s1194_s5 + $0x30] sm:$0xff]   ;;  %v876_v27 = vld [vmem:[%s1194_s5 + $0x68] sm:$0xff]   ;;  %s696_s11 = sshll.u32 %s927_s10, 4  ;;  %s697_s11 = int_to_ptr.vmem [resolvable:$true] %s696_s11 }
  0x2b   :  { %418 = vmatpush2.bf16.msra.mxu1 %v850_v35  ;;  %v50_v52 = vsub.s32 0, %v1117_v51  ;;  %v54_v54 = vsub.s32 1, %v1117_v51  ;;  %774 = vmatpush3.bf16.msra.mxu0 %v873_v24  ;;  %v877_v28 = vld [vmem:[%s1194_s5 + $0x28] sm:$0xff]   ;;  %v878_v29 = vld [vmem:[%s1194_s5 + $0x60] sm:$0xff]   ;;  %v880_v31 = vld [vmem:[%s1194_s5 + $0x58] sm:$0xff]   ;;  %s904_s12 = scalar_lea.vmem %s697_s11, 256  ;;  %p909_p1 = scmp.lt.s32.totalorder %s697_s11, %s697_s11 }
  0x2c   :  { %419 = vmatprep.subr.bf16.mxu1 %v851_v36  ;;  %775 = vmatprep.subr.bf16.mxu0 %v874_v25  ;;  %v879_v30 = vld [vmem:[%s1194_s5 + $0x20] sm:$0xff]   ;;  %v881_v32 = vld [vmem:[%s1194_s5 + $0x18] sm:$0xff]   ;;  %v882_v33 = vld [vmem:[%s1194_s5 + $0x50] sm:$0xff]   ;;  %p905_p0 = scmp.ne.s32.totalorder %s697_s11, %s904_s12  ;;  %p910_p2 = scmp.lt.s32.totalorder %s904_s12, %s904_s12 }
  0x2d   :  { %v51_v55 = vrot.slane %v46_v53, %v50_v52  ;;  %v55_v56 = vrot.slane %v46_v53, %v54_v54  ;;  %v883_v34 = vld [vmem:[%s1194_s5 + $0x10] sm:$0xff]   ;;  %v884_v35 = vld [vmem:[%s1194_s5 + $0x48] sm:$0xff]  }
  0x2e   :  { %v885_v36 = vld [vmem:[%s1194_s5 + $0x8] sm:$0xff]   ;;  %p911_p3 = por %p910_p2, %p909_p1 }
  0x2f   :  { %420 = vmatpush2.bf16.msra.mxu1 %v853_v37  ;;  %776 = vmatpush3.bf16.msra.mxu0 %v875_v26  ;;  %v886_v37 = vld [vmem:[%s1194_s5 + $0x40] sm:$0xff]  }
  0x30   :  { %421 = vmatprep.subr.bf16.mxu1 %v854_v38  ;;  %777 = vmatprep.subr.bf16.mxu0 %v876_v27  ;;  %v887_v38 = vld [vmem:[%s1194_s5] sm:$0xff]   ;;  %p912_p4 = pnand %p911_p3, %p905_p0 }
  0x33   :  { %422 = vmatpush2.bf16.msra.mxu1 %v856_v39  ;;  %778 = vmatpush3.bf16.msra.mxu0 %v877_v28  ;;  %v475_v39 = vld [vmem:[%s1193_s4] sm:$0x3] }
  0x34   :  { %423 = vmatprep.subr.bf16.mxu1 %v857_v40  ;;  %779 = vmatprep.subr.bf16.mxu0 %v878_v29  ;;  %v480_v40 = vrot.slane %v475_v39, %v50_v52 }
  0x37   :  { %424 = vmatpush2.bf16.msra.mxu1 %v859_v41  ;;  %780 = vmatpush3.bf16.msra.mxu0 %v879_v30  ;;  %v484_v41 = vrot.slane %v475_v39, %v54_v54 }
  0x38   :  { %425 = vmatprep.subr.bf16.mxu1 %v860_v42  ;;  %781 = vmatprep.subr.bf16.mxu0 %v880_v31 }
  0x3b   :  { %426 = vmatpush2.bf16.msra.mxu1 %v862_v43  ;;  %782 = vmatpush3.bf16.msra.mxu0 %v881_v32 }
  0x3c   :  { %427 = vmatprep.subr.bf16.mxu1 %v863_v44  ;;  %783 = vmatprep.subr.bf16.mxu0 %v882_v33 }
  0x3f   :  { %428 = vmatpush2.bf16.msra.mxu1 %v865_v45  ;;  %784 = vmatpush3.bf16.msra.mxu0 %v883_v34 }
  0x40   :  { %429 = vmatprep.subr.bf16.mxu1 %v866_v46  ;;  %785 = vmatprep.subr.bf16.mxu0 %v884_v35 }
  0x43   :  { %430 = vmatpush2.bf16.msra.mxu1 %v868_v47  ;;  %786 = vmatpush3.bf16.msra.mxu0 %v885_v36 }
  0x44   :  { %431 = vmatprep.subr.bf16.mxu1 %v869_v48  ;;  %787 = vmatprep.subr.bf16.mxu0 %v886_v37 }
  0x47   :  { %432 = vmatpush2.bf16.msra.mxu1 %v871_v49  ;;  %788 = vmatpush3.bf16.msra.mxu0 %v887_v38 }
  0xe2   :  { %v178_v57 = vpop.f32.mrf.mxu0 }
  0xe3   :  { %v179_v58 = vadd.f32 %v178_v57, %v51_v55 }
  0xe4   :  { %v180_v59 = vpop.f32.mrf.mxu0 }
  0xe5   :  { %v181_v60 = vadd.f32 %v180_v59, %v55_v56  ;;  %v191_v61 = vmul.f32 0.70710677, %v179_v58  ;;  %v187_v16 = vmul.f32 0.5, %v179_v58 }
  0xe6   :  { %v182_v62 = vpop.f32.mrf.mxu0 }
  0xe7   :  { %v192_v63 = vmul.f32 0.70710677, %v181_v60  ;;  %v183_v0 = vadd.f32 %v182_v62, %v51_v55  ;;  %v188_v13 = vmul.f32 0.5, %v181_v60 }
  0xe8   :  { %v184_v1 = vpop.f32.mrf.mxu0 }
  0xe9   :  { %888 = verf.f32 %v192_v63  ;;  %v193_v2 = vmul.f32 0.70710677, %v183_v0  ;;  %v185_v3 = vadd.f32 %v184_v1, %v55_v56  ;;  %v189_v12 = vmul.f32 0.5, %v183_v0 }
  0xea   :  { %890 = verf.f32 %v191_v61 }
  0xeb   :  { %892 = verf.f32 %v193_v2  ;;  %v194_v4 = vmul.f32 0.70710677, %v185_v3  ;;  %v190_v14 = vmul.f32 0.5, %v185_v3 }
  0xed   :  { %894 = verf.f32 %v194_v4 }
  0xf6   :  { %v889_v5 = vpop.eup %888 }
  0xf7   :  { %v891_v6 = vpop.eup %890  ;;  %v200_v9 = vadd.f32 1.0, %v889_v5 }
  0xf8   :  { %v893_v7 = vpop.eup %892  ;;  %v199_v11 = vadd.f32 1.0, %v891_v6 }
  0xf9   :  { %v201_v8 = vadd.f32 1.0, %v893_v7  ;;  %v204_v18 = vmul.f32 %v200_v9, %v188_v13  ;;  %v756_v9 = vld [vmem:[%s1195_s6] ss:$0 sm:$0xff] }
  0xfa   :  { %v895_v10 = vpop.eup %894  ;;  %v203_v20 = vmul.f32 %v199_v11, %v187_v16 }
  0xfb   :  { %v202_v15 = vadd.f32 1.0, %v895_v10  ;;  %v205_v17 = vmul.f32 %v201_v8, %v189_v12 }
  0xfd   :  { %v206_v19 = vmul.f32 %v202_v15, %v190_v14  ;;  %v207_v22 = vpack.c.bf16 %v205_v17, %v203_v20 }
  0xff   :  { %v208_v21 = vpack.c.bf16 %v206_v19, %v204_v18 }
 0x101   :  { %433 = vmatprep.mubr.bf16.mxu1 %v208_v21 }
 0x102   :  { %434 = vmatmul.mubr.bf16.vlgmr.msra.gmra.mxu1 %v207_v22 }
 0x1c2   :  { %v435_v42 = vpop.f32.mrf.mxu1 }
 0x1c3   :  { %v487_v43 = vadd.f32 %v480_v40, %v435_v42 }
 0x1c4   :  { %v437_v44 = vpop.f32.mrf.mxu1 }
 0x1c5   :  { %v488_v45 = vadd.f32 %v484_v41, %v437_v44  ;;  %v495_v46 = vmul.f32 0.70710677, %v487_v43  ;;  %v491_v1 = vmul.f32 0.5, %v487_v43 }
 0x1c6   :  { %v439_v47 = vpop.f32.mrf.mxu1 }
 0x1c7   :  { %v496_v48 = vmul.f32 0.70710677, %v488_v45  ;;  %v489_v49 = vadd.f32 %v480_v40, %v439_v47  ;;  %v492_v62 = vmul.f32 0.5, %v488_v45 }
 0x1c8   :  { %v441_v50 = vpop.f32.mrf.mxu1 }
 0x1c9   :  { %896 = verf.f32 %v496_v48  ;;  %v497_v53 = vmul.f32 0.70710677, %v489_v49  ;;  %v490_v55 = vadd.f32 %v484_v41, %v441_v50  ;;  %v493_v61 = vmul.f32 0.5, %v489_v49 }
 0x1ca   :  { %898 = verf.f32 %v495_v46 }
 0x1cb   :  { %900 = verf.f32 %v497_v53  ;;  %v498_v56 = vmul.f32 0.70710677, %v490_v55  ;;  %v494_v63 = vmul.f32 0.5, %v490_v55 }
 0x1cd   :  { %902 = verf.f32 %v498_v56 }
 0x1d6   :  { %v897_v52 = vpop.eup %896 }
 0x1d7   :  { %v899_v57 = vpop.eup %898  ;;  %v504_v54 = vadd.f32 1.0, %v897_v52 }
 0x1d8   :  { %v901_v51 = vpop.eup %900  ;;  %v503_v60 = vadd.f32 1.0, %v899_v57 }
 0x1d9   :  { %v505_v58 = vadd.f32 1.0, %v901_v51  ;;  %v508_v3 = vmul.f32 %v504_v54, %v492_v62 }
 0x1da   :  { %v903_v59 = vpop.eup %902  ;;  %v507_v5 = vmul.f32 %v503_v60, %v491_v1 }
 0x1db   :  { %v506_v0 = vadd.f32 1.0, %v903_v59  ;;  %v509_v2 = vmul.f32 %v505_v58, %v493_v61 }
 0x1dd   :  { %v510_v4 = vmul.f32 %v506_v0, %v494_v63  ;;  %v511_v7 = vpack.c.bf16 %v509_v2, %v507_v5 }
 0x1df   :  { %v512_v6 = vpack.c.bf16 %v510_v4, %v508_v3 }
 0x1e1   :  { %680 = vmatprep.mubr.bf16.mxu0 %v512_v6 }
 0x1e2   :  { %681 = vmatmul.mubr.bf16.vlgmr.msra.gmra.mxu0 %v511_v7 }
 0x2a2   :  { %v789_v8 = vpop.f32.mrf.mxu0 }
 0x2a4   :  { %v790_v10 = vpop.f32.mrf.mxu0 }
 0x2a5   :  { %v791_v11 = vadd.f32 %v790_v10, %v789_v8 }
 0x2a6   :  { %v792_v12 = vpop.f32.mrf.mxu0 }
 0x2a7   :  { %v683_v13 = vadd.f32 %v791_v11, %v756_v9 }
 0x2a8   :  { %v793_v14 = vpop.f32.mrf.mxu0 }
 0x2a9   :  { %689 = vst [vmem:[#allocation3] sm:$0xff] %v683_v13  ;;  %v794_v15 = vadd.f32 %v793_v14, %v792_v12 }
 0x2ab   :  { %v686_v16 = vadd.f32 %v794_v15, %v756_v9 }
 0x2ad   :  { %690 = vst [vmem:[#allocation3 + $0x8] sm:$0xff] %v686_v16 }
 0x2ae   :  { %915 = shalt.err (!%p912_p4)
}
 0x2af   :  { %s928_s6 = smov 128   ;;  %s929_s1 = smov 8  }
 0x2b0   :  { %702 = dma.vmem_to_hbm [thread:$0]  %s697_s11, 256, %s1196_s7, [#allocation4], %s928_s6, %s928_s6, %s929_s1  }
 0x2b1   :  { %924 = dma.done.wait [#allocation4], 256  }
 0x2b2   :  { %925 = vsyncadd [#allocation4], 4294967040 }
 0x2b3   :  { %706 = vsyncpa [#allocation4], 1 }

// kernel: _mlp_head_impl.1
= control target key start
LH: loop header
LB: loop body
LE: loop exit
PB: predicated region body
PF: predicated region fallthrough
CT: control target
= control target key end

     0   :  { %v926_v2 = vmov 0   ;;  %s1189_s0 = inlined_call_operand.vmem [shape: bf16[16,128], index: 0, kind: input, shape index: {}]   ;;  %s1190_s1 = inlined_call_operand.vmem [shape: bf16[128,256], index: 1, kind: input, shape index: {}]   ;;  %s1191_s2 = inlined_call_operand.vmem [shape: f32[1,256], index: 2, kind: input, shape index: {}]   ;;  %s1192_s3 = inlined_call_operand.vmem [shape: bf16[256,256], index: 3, kind: input, shape index: {}]   ;;  %s1193_s4 = inlined_call_operand.vmem [shape: f32[1,256], index: 4, kind: input, shape index: {}]   ;;  %s1194_s5 = inlined_call_operand.vmem [shape: bf16[256,128], index: 5, kind: input, shape index: {}]   ;;  %s1195_s6 = inlined_call_operand.vmem [shape: f32[1,128], index: 6, kind: input, shape index: {}]   ;;  %s1196_s7 = inlined_call_operand.hbm [shape: f32[16,128], index: 7, kind: output, shape index: {}]  }
   0x1   :  { %v799_v0 = vld [vmem:[%s1190_s1 + $0x74] ss:$8 sps:$4 sm:$0xff]   ;;  %v801_v1 = vld [vmem:[%s1190_s1 + $0x70] ss:$8 sps:$4 sm:$0xff]   ;;  %176 = vmatprep.mubr.bf16.mxu0 %v926_v2  ;;  %v802_v3 = vld [vmem:[%s1190_s1 + $0x64] ss:$8 sps:$4 sm:$0xff]  }
   0x2   :  { %144 = vmatprep.subr.bf16.mxu0 %v799_v0  ;;  %v804_v4 = vld [vmem:[%s1190_s1 + $0x60] ss:$8 sps:$4 sm:$0xff]   ;;  %v805_v5 = vld [vmem:[%s1190_s1 + $0x54] ss:$8 sps:$4 sm:$0xff]   ;;  %v807_v6 = vld [vmem:[%s1190_s1 + $0x50] ss:$8 sps:$4 sm:$0xff]  }
   0x3   :  { %145 = vmatpush1.bf16.msra.mxu0 %v801_v1  ;;  %v808_v7 = vld [vmem:[%s1190_s1 + $0x44] ss:$8 sps:$4 sm:$0xff]   ;;  %v810_v8 = vld [vmem:[%s1190_s1 + $0x40] ss:$8 sps:$4 sm:$0xff]   ;;  %v811_v9 = vld [vmem:[%s1190_s1 + $0x34] ss:$8 sps:$4 sm:$0xff]  }
   0x4   :  { %146 = vmatprep.subr.bf16.mxu0 %v802_v3  ;;  %v824_v10 = vld [vmem:[%s1192_s3 + $0x74] ss:$8 sps:$4 sm:$0xff]   ;;  %v826_v11 = vld [vmem:[%s1192_s3 + $0x70] ss:$8 sps:$4 sm:$0xff]   ;;  %v827_v12 = vld [vmem:[%s1192_s3 + $0x64] ss:$8 sps:$4 sm:$0xff]  }
   0x5   :  { %401 = vmatprep.subr.bf16.mxu1 %v824_v10  ;;  %v813_v13 = vld [vmem:[%s1190_s1 + $0x30] ss:$8 sps:$4 sm:$0xff]   ;;  %v829_v14 = vld [vmem:[%s1192_s3 + $0x60] ss:$8 sps:$4 sm:$0xff]   ;;  %v814_v15 = vld [vmem:[%s1190_s1 + $0x24] ss:$8 sps:$4 sm:$0xff]  }
   0x6   :  { %402 = vmatpush1.bf16.msra.mxu1 %v826_v11  ;;  %v830_v16 = vld [vmem:[%s1192_s3 + $0x54] ss:$8 sps:$4 sm:$0xff]   ;;  %v816_v17 = vld [vmem:[%s1190_s1 + $0x20] ss:$8 sps:$4 sm:$0xff]   ;;  %v832_v18 = vld [vmem:[%s1192_s3 + $0x50] ss:$8 sps:$4 sm:$0xff]  }
   0x7   :  { %147 = vmatpush1.bf16.msra.mxu0 %v804_v4  ;;  %403 = vmatprep.subr.bf16.mxu1 %v827_v12  ;;  %v817_v19 = vld [vmem:[%s1190_s1 + $0x14] ss:$8 sps:$4 sm:$0xff]   ;;  %v833_v20 = vld [vmem:[%s1192_s3 + $0x44] ss:$8 sps:$4 sm:$0xff]   ;;  %v819_v21 = vld [vmem:[%s1190_s1 + $0x10] ss:$8 sps:$4 sm:$0xff]  }
   0x8   :  { %148 = vmatprep.subr.bf16.mxu0 %v805_v5  ;;  %v820_v22 = vld [vmem:[%s1190_s1 + $0x4] ss:$8 sps:$4 sm:$0xff]   ;;  %v835_v23 = vld [vmem:[%s1192_s3 + $0x40] ss:$8 sps:$4 sm:$0xff]   ;;  %v836_v24 = vld [vmem:[%s1192_s3 + $0x34] ss:$8 sps:$4 sm:$0xff]  }
   0x9   :  { %v822_v25 = vld [vmem:[%s1190_s1] ss:$8 sps:$4 sm:$0xff]   ;;  %v838_v26 = vld [vmem:[%s1192_s3 + $0x30] ss:$8 sps:$4 sm:$0xff]   ;;  %v839_v27 = vld [vmem:[%s1192_s3 + $0x24] ss:$8 sps:$4 sm:$0xff]  }
   0xa   :  { %404 = vmatpush1.bf16.msra.mxu1 %v829_v14  ;;  %v823_v28 = vld [vmem:[%s1189_s0] sm:$0xff]   ;;  %v842_v30 = vld [vmem:[%s1192_s3 + $0x14] ss:$8 sps:$4 sm:$0xff]   ;;  %v844_v31 = vld [vmem:[%s1192_s3 + $0x10] ss:$8 sps:$4 sm:$0xff]  }
   0xb   :  { %149 = vmatpush1.bf16.msra.mxu0 %v807_v6  ;;  %405 = vmatprep.subr.bf16.mxu1 %v830_v16  ;;  %v841_v29 = vld [vmem:[%s1192_s3 + $0x20] ss:$8 sps:$4 sm:$0xff]   ;;  %v845_v32 = vld [vmem:[%s1192_s3 + $0x4] ss:$8 sps:$4 sm:$0xff]  }
   0xc   :  { %150 = vmatprep.subr.bf16.mxu0 %v808_v7 }
   0xe   :  { %406 = vmatpush1.bf16.msra.mxu1 %v832_v18 }
   0xf   :  { %151 = vmatpush1.bf16.msra.mxu0 %v810_v8  ;;  %407 = vmatprep.subr.bf16.mxu1 %v833_v20 }
  0x10   :  { %152 = vmatprep.subr.bf16.mxu0 %v811_v9 }
  0x12   :  { %408 = vmatpush1.bf16.msra.mxu1 %v835_v23 }
  0x13   :  { %153 = vmatpush1.bf16.msra.mxu0 %v813_v13  ;;  %409 = vmatprep.subr.bf16.mxu1 %v836_v24 }
  0x14   :  { %154 = vmatprep.subr.bf16.mxu0 %v814_v15 }
  0x16   :  { %410 = vmatpush1.bf16.msra.mxu1 %v838_v26 }
  0x17   :  { %155 = vmatpush1.bf16.msra.mxu0 %v816_v17  ;;  %411 = vmatprep.subr.bf16.mxu1 %v839_v27 }
  0x18   :  { %156 = vmatprep.subr.bf16.mxu0 %v817_v19 }
  0x1a   :  { %412 = vmatpush1.bf16.msra.mxu1 %v841_v29 }
  0x1b   :  { %157 = vmatpush1.bf16.msra.mxu0 %v819_v21  ;;  %413 = vmatprep.subr.bf16.mxu1 %v842_v30 }
  0x1c   :  { %158 = vmatprep.subr.bf16.mxu0 %v820_v22 }
  0x1f   :  { %159 = vmatpush1.bf16.msra.mxu0 %v822_v25 }
  0x22   :  { %177 = vmatmul.mubr.bf16.vlgmr.msra.gmra.mxu0 %v823_v28 }
  0x23   :  { %12 = vsyncpa [#allocation4], 0  ;;  %414 = vmatpush1.bf16.msra.mxu1 %v844_v31  ;;  %v847_v33 = vld [vmem:[%s1192_s3] ss:$8 sps:$4 sm:$0xff]   ;;  %v848_v34 = vld [vmem:[%s1192_s3 + $0xf4] ss:$8 sps:$4 sm:$0xff]   ;;  %v48_v50 = vlaneseq }
  0x24   :  { %415 = vmatprep.subr.bf16.mxu1 %v845_v32  ;;  %v850_v35 = vld [vmem:[%s1192_s3 + $0xf0] ss:$8 sps:$4 sm:$0xff]   ;;  %v851_v36 = vld [vmem:[%s1192_s3 + $0xe4] ss:$8 sps:$4 sm:$0xff]   ;;  %v853_v37 = vld [vmem:[%s1192_s3 + $0xe0] ss:$8 sps:$4 sm:$0xff]  }
  0x25   :  { %v854_v38 = vld [vmem:[%s1192_s3 + $0xd4] ss:$8 sps:$4 sm:$0xff]   ;;  %v856_v39 = vld [vmem:[%s1192_s3 + $0xd0] ss:$8 sps:$4 sm:$0xff]   ;;  %v857_v40 = vld [vmem:[%s1192_s3 + $0xc4] ss:$8 sps:$4 sm:$0xff]  }
  0x26   :  { %v859_v41 = vld [vmem:[%s1192_s3 + $0xc0] ss:$8 sps:$4 sm:$0xff]   ;;  %v860_v42 = vld [vmem:[%s1192_s3 + $0xb4] ss:$8 sps:$4 sm:$0xff]   ;;  %v862_v43 = vld [vmem:[%s1192_s3 + $0xb0] ss:$8 sps:$4 sm:$0xff]  }
  0x27   :  { %416 = vmatpush1.bf16.msra.mxu1 %v847_v33  ;;  %v863_v44 = vld [vmem:[%s1192_s3 + $0xa4] ss:$8 sps:$4 sm:$0xff]   ;;  %v865_v45 = vld [vmem:[%s1192_s3 + $0xa0] ss:$8 sps:$4 sm:$0xff]   ;;  %v866_v46 = vld [vmem:[%s1192_s3 + $0x94] ss:$8 sps:$4 sm:$0xff]  }
  0x28   :  { %417 = vmatprep.subr.bf16.mxu1 %v848_v34  ;;  %v868_v47 = vld [vmem:[%s1192_s3 + $0x90] ss:$8 sps:$4 sm:$0xff]   ;;  %v869_v48 = vld [vmem:[%s1192_s3 + $0x84] ss:$8 sps:$4 sm:$0xff]   ;;  %v871_v49 = vld [vmem:[%s1192_s3 + $0x80] ss:$8 sps:$4 sm:$0xff]  }
  0x29   :  { %v1117_v51 = vshrl.u32 %v48_v50, 7  ;;  %v46_v53 = vld [vmem:[%s1191_s2] sm:$0x3]  ;;  %v872_v23 = vld [vmem:[%s1194_s5 + $0x78] sm:$0xff]   ;;  %v874_v25 = vld [vmem:[%s1194_s5 + $0x70] sm:$0xff]   ;;  %s927_s10 = smov [#allocation3]  }
  0x2a   :  { %v873_v24 = vld [vmem:[%s1194_s5 + $0x38] sm:$0xff]   ;;  %773 = vmatprep.subr.bf16.mxu0 %v872_v23  ;;  %v875_v26 = vld [vmem:[%s1194_s5 + $0x30] sm:$0xff]   ;;  %v876_v27 = vld [vmem:[%s1194_s5 + $0x68] sm:$0xff]   ;;  %s696_s11 = sshll.u32 %s927_s10, 4  ;;  %s697_s11 = int_to_ptr.vmem [resolvable:$true] %s696_s11 }
  0x2b   :  { %418 = vmatpush2.bf16.msra.mxu1 %v850_v35  ;;  %v50_v52 = vsub.s32 0, %v1117_v51  ;;  %v54_v54 = vsub.s32 1, %v1117_v51  ;;  %774 = vmatpush3.bf16.msra.mxu0 %v873_v24  ;;  %v877_v28 = vld [vmem:[%s1194_s5 + $0x28] sm:$0xff]   ;;  %v878_v29 = vld [vmem:[%s1194_s5 + $0x60] sm:$0xff]   ;;  %v880_v31 = vld [vmem:[%s1194_s5 + $0x58] sm:$0xff]   ;;  %s904_s12 = scalar_lea.vmem %s697_s11, 256  ;;  %p909_p1 = scmp.lt.s32.totalorder %s697_s11, %s697_s11 }
  0x2c   :  { %419 = vmatprep.subr.bf16.mxu1 %v851_v36  ;;  %775 = vmatprep.subr.bf16.mxu0 %v874_v25  ;;  %v879_v30 = vld [vmem:[%s1194_s5 + $0x20] sm:$0xff]   ;;  %v881_v32 = vld [vmem:[%s1194_s5 + $0x18] sm:$0xff]   ;;  %v882_v33 = vld [vmem:[%s1194_s5 + $0x50] sm:$0xff]   ;;  %p905_p0 = scmp.ne.s32.totalorder %s697_s11, %s904_s12  ;;  %p910_p2 = scmp.lt.s32.totalorder %s904_s12, %s904_s12 }
  0x2d   :  { %v51_v55 = vrot.slane %v46_v53, %v50_v52  ;;  %v55_v56 = vrot.slane %v46_v53, %v54_v54  ;;  %v883_v34 = vld [vmem:[%s1194_s5 + $0x10] sm:$0xff]   ;;  %v884_v35 = vld [vmem:[%s1194_s5 + $0x48] sm:$0xff]  }
  0x2e   :  { %v885_v36 = vld [vmem:[%s1194_s5 + $0x8] sm:$0xff]   ;;  %p911_p3 = por %p910_p2, %p909_p1 }
  0x2f   :  { %420 = vmatpush2.bf16.msra.mxu1 %v853_v37  ;;  %776 = vmatpush3.bf16.msra.mxu0 %v875_v26  ;;  %v886_v37 = vld [vmem:[%s1194_s5 + $0x40] sm:$0xff]  }
  0x30   :  { %421 = vmatprep.subr.bf16.mxu1 %v854_v38  ;;  %777 = vmatprep.subr.bf16.mxu0 %v876_v27  ;;  %v887_v38 = vld [vmem:[%s1194_s5] sm:$0xff]   ;;  %p912_p4 = pnand %p911_p3, %p905_p0 }
  0x33   :  { %422 = vmatpush2.bf16.msra.mxu1 %v856_v39  ;;  %778 = vmatpush3.bf16.msra.mxu0 %v877_v28  ;;  %v475_v39 = vld [vmem:[%s1193_s4] sm:$0x3] }
  0x34   :  { %423 = vmatprep.subr.bf16.mxu1 %v857_v40  ;;  %779 = vmatprep.subr.bf16.mxu0 %v878_v29  ;;  %v480_v40 = vrot.slane %v475_v39, %v50_v52 }
  0x37   :  { %424 = vmatpush2.bf16.msra.mxu1 %v859_v41  ;;  %780 = vmatpush3.bf16.msra.mxu0 %v879_v30  ;;  %v484_v41 = vrot.slane %v475_v39, %v54_v54 }
  0x38   :  { %425 = vmatprep.subr.bf16.mxu1 %v860_v42  ;;  %781 = vmatprep.subr.bf16.mxu0 %v880_v31 }
  0x3b   :  { %426 = vmatpush2.bf16.msra.mxu1 %v862_v43  ;;  %782 = vmatpush3.bf16.msra.mxu0 %v881_v32 }
  0x3c   :  { %427 = vmatprep.subr.bf16.mxu1 %v863_v44  ;;  %783 = vmatprep.subr.bf16.mxu0 %v882_v33 }
  0x3f   :  { %428 = vmatpush2.bf16.msra.mxu1 %v865_v45  ;;  %784 = vmatpush3.bf16.msra.mxu0 %v883_v34 }
  0x40   :  { %429 = vmatprep.subr.bf16.mxu1 %v866_v46  ;;  %785 = vmatprep.subr.bf16.mxu0 %v884_v35 }
  0x43   :  { %430 = vmatpush2.bf16.msra.mxu1 %v868_v47  ;;  %786 = vmatpush3.bf16.msra.mxu0 %v885_v36 }
  0x44   :  { %431 = vmatprep.subr.bf16.mxu1 %v869_v48  ;;  %787 = vmatprep.subr.bf16.mxu0 %v886_v37 }
  0x47   :  { %432 = vmatpush2.bf16.msra.mxu1 %v871_v49  ;;  %788 = vmatpush3.bf16.msra.mxu0 %v887_v38 }
  0xe2   :  { %v178_v57 = vpop.f32.mrf.mxu0 }
  0xe3   :  { %v179_v58 = vadd.f32 %v178_v57, %v51_v55 }
  0xe4   :  { %v180_v59 = vpop.f32.mrf.mxu0 }
  0xe5   :  { %v181_v60 = vadd.f32 %v180_v59, %v55_v56  ;;  %v191_v61 = vmul.f32 0.70710677, %v179_v58  ;;  %v187_v16 = vmul.f32 0.5, %v179_v58 }
  0xe6   :  { %v182_v62 = vpop.f32.mrf.mxu0 }
  0xe7   :  { %v192_v63 = vmul.f32 0.70710677, %v181_v60  ;;  %v183_v0 = vadd.f32 %v182_v62, %v51_v55  ;;  %v188_v13 = vmul.f32 0.5, %v181_v60 }
  0xe8   :  { %v184_v1 = vpop.f32.mrf.mxu0 }
  0xe9   :  { %888 = verf.f32 %v192_v63  ;;  %v193_v2 = vmul.f32 0.70710677, %v183_v0  ;;  %v185_v3 = vadd.f32 %v184_v1, %v55_v56  ;;  %v189_v12 = vmul.f32 0.5, %v183_v0 }
  0xea   :  { %890 = verf.f32 %v191_v61 }
  0xeb   :  { %892 = verf.f32 %v193_v2  ;;  %v194_v4 = vmul.f32 0.70710677, %v185_v3  ;;  %v190_v14 = vmul.f32 0.5, %v185_v3 }
  0xed   :  { %894 = verf.f32 %v194_v4 }
  0xf6   :  { %v889_v5 = vpop.eup %888 }
  0xf7   :  { %v891_v6 = vpop.eup %890  ;;  %v200_v9 = vadd.f32 1.0, %v889_v5 }
  0xf8   :  { %v893_v7 = vpop.eup %892  ;;  %v199_v11 = vadd.f32 1.0, %v891_v6 }
  0xf9   :  { %v201_v8 = vadd.f32 1.0, %v893_v7  ;;  %v204_v18 = vmul.f32 %v200_v9, %v188_v13  ;;  %v756_v9 = vld [vmem:[%s1195_s6] ss:$0 sm:$0xff] }
  0xfa   :  { %v895_v10 = vpop.eup %894  ;;  %v203_v20 = vmul.f32 %v199_v11, %v187_v16 }
  0xfb   :  { %v202_v15 = vadd.f32 1.0, %v895_v10  ;;  %v205_v17 = vmul.f32 %v201_v8, %v189_v12 }
  0xfd   :  { %v206_v19 = vmul.f32 %v202_v15, %v190_v14  ;;  %v207_v22 = vpack.c.bf16 %v205_v17, %v203_v20 }
  0xff   :  { %v208_v21 = vpack.c.bf16 %v206_v19, %v204_v18 }
 0x101   :  { %433 = vmatprep.mubr.bf16.mxu1 %v208_v21 }
 0x102   :  { %434 = vmatmul.mubr.bf16.vlgmr.msra.gmra.mxu1 %v207_v22 }
 0x1c2   :  { %v435_v42 = vpop.f32.mrf.mxu1 }
 0x1c3   :  { %v487_v43 = vadd.f32 %v480_v40, %v435_v42 }
 0x1c4   :  { %v437_v44 = vpop.f32.mrf.mxu1 }
 0x1c5   :  { %v488_v45 = vadd.f32 %v484_v41, %v437_v44  ;;  %v495_v46 = vmul.f32 0.70710677, %v487_v43  ;;  %v491_v1 = vmul.f32 0.5, %v487_v43 }
 0x1c6   :  { %v439_v47 = vpop.f32.mrf.mxu1 }
 0x1c7   :  { %v496_v48 = vmul.f32 0.70710677, %v488_v45  ;;  %v489_v49 = vadd.f32 %v480_v40, %v439_v47  ;;  %v492_v62 = vmul.f32 0.5, %v488_v45 }
 0x1c8   :  { %v441_v50 = vpop.f32.mrf.mxu1 }
 0x1c9   :  { %896 = verf.f32 %v496_v48  ;;  %v497_v53 = vmul.f32 0.70710677, %v489_v49  ;;  %v490_v55 = vadd.f32 %v484_v41, %v441_v50  ;;  %v493_v61 = vmul.f32 0.5, %v489_v49 }
 0x1ca   :  { %898 = verf.f32 %v495_v46 }
 0x1cb   :  { %900 = verf.f32 %v497_v53  ;;  %v498_v56 = vmul.f32 0.70710677, %v490_v55  ;;  %v494_v63 = vmul.f32 0.5, %v490_v55 }
 0x1cd   :  { %902 = verf.f32 %v498_v56 }
 0x1d6   :  { %v897_v52 = vpop.eup %896 }
 0x1d7   :  { %v899_v57 = vpop.eup %898  ;;  %v504_v54 = vadd.f32 1.0, %v897_v52 }
 0x1d8   :  { %v901_v51 = vpop.eup %900  ;;  %v503_v60 = vadd.f32 1.0, %v899_v57 }
 0x1d9   :  { %v505_v58 = vadd.f32 1.0, %v901_v51  ;;  %v508_v3 = vmul.f32 %v504_v54, %v492_v62 }
 0x1da   :  { %v903_v59 = vpop.eup %902  ;;  %v507_v5 = vmul.f32 %v503_v60, %v491_v1 }
 0x1db   :  { %v506_v0 = vadd.f32 1.0, %v903_v59  ;;  %v509_v2 = vmul.f32 %v505_v58, %v493_v61 }
 0x1dd   :  { %v510_v4 = vmul.f32 %v506_v0, %v494_v63  ;;  %v511_v7 = vpack.c.bf16 %v509_v2, %v507_v5 }
 0x1df   :  { %v512_v6 = vpack.c.bf16 %v510_v4, %v508_v3 }
 0x1e1   :  { %680 = vmatprep.mubr.bf16.mxu0 %v512_v6 }
 0x1e2   :  { %681 = vmatmul.mubr.bf16.vlgmr.msra.gmra.mxu0 %v511_v7 }
 0x2a2   :  { %v789_v8 = vpop.f32.mrf.mxu0 }
 0x2a4   :  { %v790_v10 = vpop.f32.mrf.mxu0 }
 0x2a5   :  { %v791_v11 = vadd.f32 %v790_v10, %v789_v8 }
 0x2a6   :  { %v792_v12 = vpop.f32.mrf.mxu0 }
 0x2a7   :  { %v683_v13 = vadd.f32 %v791_v11, %v756_v9 }
 0x2a8   :  { %v793_v14 = vpop.f32.mrf.mxu0 }
 0x2a9   :  { %689 = vst [vmem:[#allocation3] sm:$0xff] %v683_v13  ;;  %v794_v15 = vadd.f32 %v793_v14, %v792_v12 }
 0x2ab   :  { %v686_v16 = vadd.f32 %v794_v15, %v756_v9 }
 0x2ad   :  { %690 = vst [vmem:[#allocation3 + $0x8] sm:$0xff] %v686_v16 }
 0x2ae   :  { %915 = shalt.err (!%p912_p4)
}
 0x2af   :  { %s928_s6 = smov 128   ;;  %s929_s1 = smov 8  }
 0x2b0   :  { %702 = dma.vmem_to_hbm [thread:$0]  %s697_s11, 256, %s1196_s7, [#allocation4], %s928_s6, %s928_s6, %s929_s1  }
 0x2b1   :  { %924 = dma.done.wait [#allocation4], 256  }
 0x2b2   :  { %925 = vsyncadd [#allocation4], 4294967040 }
 0x2b3   :  { %706 = vsyncpa [#allocation4], 1 }

</bundles_post_ra>
